<compile_context>
chip_gen: v7x
topology: tpu7x:2x2x1
jax: 0.10.0
libtpu: 0.0.40
codegen_flags: <defaults>
</compile_context>

<pallas_src>
import math

import jax
import jax.numpy as jnp
from jax import lax
from jax.experimental import pallas as pl
from jax.experimental.pallas import tpu as pltpu

EPS = 1e-10
FT = 10        # conv output channels (FT == FS in the PyTorch module)
K = 17         # conv kernel width
PAD = 8        # conv padding along T ("same")
POOL = 75      # avg-pool window
STRIDE = 15    # avg-pool stride


def _scorer_kernel(x_ref, wc_ref, brow_ref, pbig_ref, lw_ref, lbr_ref, out_ref):
    # x_ref   : (RB, T)        block of rows (row = b*M + m), T on lanes
    # wc_ref  : (T, FT*T)      resident banded conv matrix ("same" padding folded in)
    # brow_ref: (1, FT*T)      conv bias broadcast over the ft-major flattened axis
    # pbig_ref: (FT*T, FT*P)   resident block-diagonal 1/75 pooling matrix
    # lw_ref  : (RB, FT*P)     per-row linear weights (lane-dense, ft-major/p-minor)
    # lbr_ref : (1, 1, RB)     per-row linear bias (lane-dense, same layout as out)
    # out_ref : (1, 1, RB)
    # MXU 1: 17-tap "same" conv for all FT filters at once.
    y = jnp.dot(x_ref[...], wc_ref[...], preferred_element_type=jnp.float32)  # (RB, FT*T)
    y = y + brow_ref[...]                       # conv bias (broadcast over rows)
    z = y * y                                   # torch.pow(y, 2)       (VPU)
    # MXU 2: all FT AvgPool2d((1,75),(1,15)) fused into one matmul.
    pooled = jnp.dot(z, pbig_ref[...], preferred_element_type=jnp.float32)    # (RB, FT*P)
    feat = jnp.log(jnp.maximum(pooled, EPS))    # log(clamp(., 1e-10))  (EUP)
    prod = feat * lw_ref[...]                   # per-channel Linear weights, per row
    # MXU 3: reduce the FT*P features straight into a lane-dense (1, RB) row.
    row = lax.dot_general(
        jnp.ones((1, prod.shape[1]), jnp.float32), prod,
        dimension_numbers=(((1,), (1,)), ((), ())),
        preferred_element_type=jnp.float32)                                   # (1, RB)
    out_ref[0] = row + lbr_ref[0]


def _round_up(x, m):
    return (x + m - 1) // m * m


def _vmem_block_bytes(rb, T, P):
    """(8,128)-padded f32 footprint of one grid step: double-buffered specs + temps."""
    FTT, FTP = FT * T, FT * P
    rb8, rb128 = _round_up(rb, 8), _round_up(rb, 128)
    Tl, FTTl, FTPl = _round_up(T, 128), _round_up(FTT, 128), _round_up(FTP, 128)
    buffered = (rb8 * Tl                       # x block
                + _round_up(T, 8) * FTTl       # Wc (resident, still 2 buffers)
                + 8 * FTTl                     # conv-bias row
                + _round_up(FTT, 8) * FTPl     # Pbig
                + rb8 * FTPl                   # per-row linear weights
                + 8 * rb128                    # per-row linear bias (1,1,RB)
                + 8 * rb128)                   # output block (1,1,RB)
    temps = 3 * rb8 * FTTl + 3 * rb8 * FTPl    # y/z and pooled/feat/prod working set
    return 4 * (2 * buffered + temps)


def _choose_rows_per_block(R, T, P, budget_bytes):
    """Largest RB (multiple of 8, divisor of R) within budget; prefer >= 2 blocks."""
    if R % 8 != 0:
        return R                                   # block must equal the full dim
    cands = [rb for rb in range(8, R + 1, 8) if R % rb == 0]
    fits = [rb for rb in cands if _vmem_block_bytes(rb, T, P) <= budget_bytes]
    if not fits:
        return cands[0]                            # smallest legal tile
    multi = [rb for rb in fits if R // rb >= 2]    # keep both v7x TCs busy
    return max(multi) if multi else max(fits)


def channel_scorer_distributed(x, conv_w, conv_b, lin_w, lin_b):
    """x: (B, 1, M, T) NCHW.  Returns (B, M, 1) float32."""
    B, C, M, T = x.shape
    assert C == 1
    assert (T - POOL) % STRIDE == 0, "module requires (T - 75) divisible by 15"
    P = (T - POOL) // STRIDE + 1
    FTT, FTP = FT * T, FT * P
    R = B * M

    x2 = x.reshape(R, T).astype(jnp.float32)       # row r = b*M + m (free view)

    # Generation-aware VMEM sizing (v5e/v6e: 128 MiB, v7x: 64 MiB).
    try:
        vmem_cap = int(pltpu.get_tpu_info().vmem_capacity_bytes)
    except Exception:
        vmem_cap = 64 * 1024 * 1024                # v7x-safe fallback
    RB = _choose_rows_per_block(R, T, P, budget_bytes=int(0.45 * vmem_cap))
    nb = R // RB
    need = _vmem_block_bytes(RB, T, P)
    vmem_limit = int(min(max(2 * need, 32 * 1024 * 1024), int(0.85 * vmem_cap)))
    vmem_limit = max(vmem_limit, int(1.25 * need))

    # Banded conv matrix: yc[r, ft*T+t] = sum_s x2[r,s] * Wc[s, ft*T+t],
    # Wc[s, ft*T+t] = conv_w[ft, s-t+PAD] if 0 <= s-t+PAD < K else 0
    # (zero padding of the "same" conv is implicit: out-of-range taps contribute 0).
    s_i = jnp.arange(T)[:, None]
    t_i = jnp.arange(T)[None, :]
    k_i = s_i - t_i + PAD
    band = (k_i >= 0) & (k_i < K)
    wc3 = jnp.where(band[None, :, :],
                    conv_w.astype(jnp.float32)[:, jnp.clip(k_i, 0, K - 1)], 0.0)
    Wc = jnp.transpose(wc3, (1, 0, 2)).reshape(T, FTT)               # (T, FT*T)

    brow = jnp.repeat(conv_b.astype(jnp.float32), T).reshape(1, FTT)  # (1, FT*T)

    # Block-diagonal pooling matrix: fuses the FT per-filter AvgPools into one matmul.
    pool = (((jnp.arange(T)[:, None] >= jnp.arange(P)[None, :] * STRIDE) &
             (jnp.arange(T)[:, None] < jnp.arange(P)[None, :] * STRIDE + POOL))
            .astype(jnp.float32) / POOL)                              # (T, P)
    Pbig = jnp.einsum("ij,tp->itjp", jnp.eye(FT, dtype=jnp.float32),
                      pool).reshape(FTT, FTP)                         # (FT*T, FT*P)

    # Per-row linear params; row r uses channel r % M (flatten order ft-major, p-minor).
    lw_rows = jnp.tile(lin_w.astype(jnp.float32).reshape(M, FTP), (B, 1))    # (R, FT*P)
    lb_rows = jnp.tile(lin_b.astype(jnp.float32), B).reshape(nb, 1, RB)      # lane-dense

    out = pl.pallas_call(
        _scorer_kernel,
        out_shape=jax.ShapeDtypeStruct((nb, 1, RB), jnp.float32),
        grid=(nb,),
        in_specs=[
            pl.BlockSpec((RB, T), lambda i: (i, 0)),          # x row block
            pl.BlockSpec((T, FTT), lambda i: (0, 0)),         # conv matrix, resident
            pl.BlockSpec((1, FTT), lambda i: (0, 0)),         # conv bias row, resident
            pl.BlockSpec((FTT, FTP), lambda i: (0, 0)),       # pooling matrix, resident
            pl.BlockSpec((RB, FTP), lambda i: (i, 0)),        # per-row linear weights
            pl.BlockSpec((1, 1, RB), lambda i: (i, 0, 0)),    # per-row linear bias
        ],
        out_specs=pl.BlockSpec((1, 1, RB), lambda i: (i, 0, 0)),
        compiler_params=pltpu.CompilerParams(
            dimension_semantics=("parallel",),                # independent row blocks
            vmem_limit_bytes=vmem_limit),
    )(x2, Wc, brow, Pbig, lw_rows, lb_rows)

    return out.reshape(B, M, 1)


def _reference(x, conv_w, conv_b, lin_w, lin_b):
    """Pure-JAX reference (lax.conv + explicit pooling) mirroring the PyTorch code."""
    B, _, M, T = x.shape
    P = (T - POOL) // STRIDE + 1
    w4 = conv_w.reshape(FT, 1, 1, K)                        # OIHW
    outs = []
    for i in range(M):
        xi = x[:, :, i:i + 1, :]                            # (B,1,1,T) NCHW
        y = lax.conv_general_dilated(
            xi, w4, window_strides=(1, 1), padding=((0, 0), (PAD, PAD)),
            dimension_numbers=("NCHW", "OIHW", "NCHW"))     # (B,FT,1,T)
        y = y + conv_b.reshape(1, FT, 1, 1)
        y = y ** 2
        pooled = jnp.stack(
            [y[..., p * STRIDE:p * STRIDE + POOL].mean(-1) for p in range(P)],
            axis=-1)                                        # (B,FT,1,P)
        feat = jnp.log(jnp.maximum(pooled, EPS)).reshape(B, -1)   # (B, FT*P)
        outs.append(feat @ lin_w[i] + lin_b[i])                   # (B,)
    return jnp.stack(outs, axis=1)[:, :, None]              # (B, M, 1)


if __name__ == "__main__":
    B, M, T = 2, 4, 120                   # T chosen so (T-75) % 15 == 0 -> P = 4
    P = (T - POOL) // STRIDE + 1

    key = jax.random.PRNGKey(0)
    kx, kcw, kcb, klw, klb = jax.random.split(key, 5)
    x = jax.random.normal(kx, (B, 1, M, T), dtype=jnp.float32)

    cbound = 1.0 / math.sqrt(1 * 1 * K)   # conv fan_in = 17
    conv_w = jax.random.uniform(kcw, (FT, K), minval=-cbound, maxval=cbound,
                                dtype=jnp.float32)
    conv_b = jax.random.uniform(kcb, (FT,), minval=-cbound, maxval=cbound,
                                dtype=jnp.float32)
    lbound = 1.0 / math.sqrt(FT * P)      # linear fan_in = 10 * P
    lin_w = jax.random.uniform(klw, (M, FT * P), minval=-lbound, maxval=lbound,
                               dtype=jnp.float32)
    lin_b = jax.random.uniform(klb, (M,), minval=-lbound, maxval=lbound,
                               dtype=jnp.float32)

    out = channel_scorer_distributed(x, conv_w, conv_b, lin_w, lin_b)
    out = jax.block_until_ready(out)

    ref = _reference(x, conv_w, conv_b, lin_w, lin_b)
    assert out.shape == (B, M, 1), out.shape
    assert jnp.allclose(out, ref, rtol=2e-4, atol=2e-4), (out, ref)
    print("KERNEL_OK")
</pallas_src>

<mosaic_0001>
module attributes {stable_mosaic.version = 11 : i64} {
  func.func @_scorer_kernel(%arg0: i32, %arg1: memref<8x120xf32, #tpu.memory_space<vmem>>, %arg2: memref<120x1200xf32, #tpu.memory_space<vmem>>, %arg3: memref<1x1200xf32, #tpu.memory_space<vmem>>, %arg4: memref<1200x40xf32, #tpu.memory_space<vmem>>, %arg5: memref<8x40xf32, #tpu.memory_space<vmem>>, %arg6: memref<1x1x8xf32, #tpu.memory_space<vmem>>, %arg7: memref<1x1x8xf32, #tpu.memory_space<vmem>>) attributes {dimension_semantics = [#tpu.dimension_semantics<parallel>], iteration_bounds = array<i64: 1>, scalar_prefetch = 0 : i64, scratch_operands = 0 : i64, tpu.core_type = #tpu.core_type<tc>, window_params = [{transform_indices = @transform_0, window_bounds = array<i64: 8, 120>}, {pipeline_mode = #tpu.pipeline_mode<synchronous>, transform_indices = @transform_1, window_bounds = array<i64: 120, 1200>}, {pipeline_mode = #tpu.pipeline_mode<synchronous>, transform_indices = @transform_2, window_bounds = array<i64: 1, 1200>}, {pipeline_mode = #tpu.pipeline_mode<synchronous>, transform_indices = @transform_3, window_bounds = array<i64: 1200, 40>}, {transform_indices = @transform_4, window_bounds = array<i64: 8, 40>}, {transform_indices = @transform_5, window_bounds = array<i64: 1, 1, 8>}, {transform_indices = @transform_6, window_bounds = array<i64: 1, 1, 8>}]} {
    %c0 = arith.constant 0 : index
    %c0_0 = arith.constant 0 : index
    %0 = vector.load %arg1[%c0, %c0_0] : memref<8x120xf32, #tpu.memory_space<vmem>>, vector<8x120xf32>
    %c0_1 = arith.constant 0 : index
    %c0_2 = arith.constant 0 : index
    %1 = vector.load %arg2[%c0_1, %c0_2] : memref<120x1200xf32, #tpu.memory_space<vmem>>, vector<120x1200xf32>
    %cst = arith.constant dense<0.000000e+00> : vector<8x1200xf32>
    %2 = tpu.matmul %0, %1, %cst {dimension_numbers = #tpu.dot_dimension_numbers<[1], [0], [0], [1], [0, 0, 1, 1], [], []>} : vector<8x120xf32>, vector<120x1200xf32>, vector<8x1200xf32> -> vector<8x1200xf32>
    %c0_3 = arith.constant 0 : index
    %c0_4 = arith.constant 0 : index
    %3 = vector.load %arg3[%c0_3, %c0_4] : memref<1x1200xf32, #tpu.memory_space<vmem>>, vector<1x1200xf32>
    %4 = vector.broadcast %3 : vector<1x1200xf32> to vector<8x1200xf32>
    %5 = arith.addf %2, %4 : vector<8x1200xf32>
    %6 = arith.mulf %5, %5 : vector<8x1200xf32>
    %c0_5 = arith.constant 0 : index
    %c0_6 = arith.constant 0 : index
    %7 = vector.load %arg4[%c0_5, %c0_6] : memref<1200x40xf32, #tpu.memory_space<vmem>>, vector<1200x40xf32>
    %cst_7 = arith.constant dense<0.000000e+00> : vector<8x40xf32>
    %8 = tpu.matmul %6, %7, %cst_7 {dimension_numbers = #tpu.dot_dimension_numbers<[1], [0], [0], [1], [0, 0, 1, 1], [], []>} : vector<8x1200xf32>, vector<1200x40xf32>, vector<8x40xf32> -> vector<8x40xf32>
    %cst_8 = arith.constant 1.000000e-10 : f32
    %9 = vector.broadcast %cst_8 : f32 to vector<8x40xf32>
    %10 = arith.maximumf %8, %9 : vector<8x40xf32>
    %11 = math.log %10 : vector<8x40xf32>
    %c0_9 = arith.constant 0 : index
    %c0_10 = arith.constant 0 : index
    %12 = vector.load %arg5[%c0_9, %c0_10] : memref<8x40xf32, #tpu.memory_space<vmem>>, vector<8x40xf32>
    %13 = arith.mulf %11, %12 : vector<8x40xf32>
    %cst_11 = arith.constant 1.000000e+00 : f32
    %14 = vector.broadcast %cst_11 : f32 to vector<1x40xf32>
    %cst_12 = arith.constant dense<0.000000e+00> : vector<1x8xf32>
    %15 = tpu.matmul %14, %13, %cst_12 {dimension_numbers = #tpu.dot_dimension_numbers<[1], [1], [0], [0], [0, 0, 1, 0], [], []>} : vector<1x40xf32>, vector<8x40xf32>, vector<1x8xf32> -> vector<1x8xf32>
    %c0_13 = arith.constant 0 : index
    %c0_14 = arith.constant 0 : index
    %c0_15 = arith.constant 0 : index
    %16 = vector.load %arg6[%c0_13, %c0_14, %c0_15] : memref<1x1x8xf32, #tpu.memory_space<vmem>>, vector<1x1x8xf32>
    %17 = vector.shape_cast %16 : vector<1x1x8xf32> to vector<1x8xf32>
    %18 = arith.addf %15, %17 : vector<1x8xf32>
    %c0_16 = arith.constant 0 : index
    %c0_17 = arith.constant 0 : index
    %c0_18 = arith.constant 0 : index
    %19 = vector.load %arg7[%c0_16, %c0_17, %c0_18] : memref<1x1x8xf32, #tpu.memory_space<vmem>>, vector<1x1x8xf32>
    %20 = vector.shape_cast %19 : vector<1x1x8xf32> to vector<1x8xf32>
    %21 = vector.shape_cast %18 : vector<1x8xf32> to vector<1x1x8xf32>
    tpu.vector_store %arg7[%c0_16, %c0_17, %c0_18], %21 {strides = array<i32>} : memref<1x1x8xf32, #tpu.memory_space<vmem>>, vector<1x1x8xf32>,
    return
  }
  func.func @transform_0(%arg0: i32) -> (i32, i32) {
    %c0_i32 = arith.constant 0 : i32
    %c0_i32_0 = arith.constant 0 : i32
    return %arg0, %c0_i32 : i32, i32
  }
  func.func @transform_1(%arg0: i32) -> (i32, i32) {
    %c0_i32 = arith.constant 0 : i32
    %c0_i32_0 = arith.constant 0 : i32
    %c0_i32_1 = arith.constant 0 : i32
    return %c0_i32, %c0_i32_0 : i32, i32
  }
  func.func @transform_2(%arg0: i32) -> (i32, i32) {
    %c0_i32 = arith.constant 0 : i32
    %c0_i32_0 = arith.constant 0 : i32
    %c0_i32_1 = arith.constant 0 : i32
    return %c0_i32, %c0_i32_0 : i32, i32
  }
  func.func @transform_3(%arg0: i32) -> (i32, i32) {
    %c0_i32 = arith.constant 0 : i32
    %c0_i32_0 = arith.constant 0 : i32
    %c0_i32_1 = arith.constant 0 : i32
    return %c0_i32, %c0_i32_0 : i32, i32
  }
  func.func @transform_4(%arg0: i32) -> (i32, i32) {
    %c0_i32 = arith.constant 0 : i32
    %c0_i32_0 = arith.constant 0 : i32
    return %arg0, %c0_i32 : i32, i32
  }
  func.func @transform_5(%arg0: i32) -> (i32, i32, i32) {
    %c0_i32 = arith.constant 0 : i32
    %c0_i32_0 = arith.constant 0 : i32
    %c0_i32_1 = arith.constant 0 : i32
    return %arg0, %c0_i32, %c0_i32_0 : i32, i32, i32
  }
  func.func @transform_6(%arg0: i32) -> (i32, i32, i32) {
    %c0_i32 = arith.constant 0 : i32
    %c0_i32_0 = arith.constant 0 : i32
    %c0_i32_1 = arith.constant 0 : i32
    return %arg0, %c0_i32, %c0_i32_0 : i32, i32, i32
  }
}

</mosaic_0001>

<bundles_post_ra>
// kernel: tpu_custom_call.1
= control target key start
LH: loop header
LB: loop body
LE: loop exit
PB: predicated region body
PF: predicated region fallthrough
CT: control target
= control target key end

     0   :  { %v1688_v7 = vmov 0.0   ;;  %vm229_vm0 = vcmask 982016   ;;  %s2713_s0 = inlined_call_operand.vmem [shape: f32[8,120], index: 0, kind: input, shape index: {}]   ;;  %s2714_s1 = inlined_call_operand.vmem [shape: f32[120,1200], index: 1, kind: input, shape index: {}]   ;;  %s2715_s2 = inlined_call_operand.vmem [shape: f32[1,1200], index: 2, kind: input, shape index: {}]   ;;  %s2716_s3 = inlined_call_operand.vmem [shape: f32[1200,40], index: 3, kind: input, shape index: {}]   ;;  %s2717_s4 = inlined_call_operand.vmem [shape: f32[8,40], index: 4, kind: input, shape index: {}]   ;;  %s2718_s5 = inlined_call_operand.vmem [shape: f32[1,1,8], index: 5, kind: input, shape index: {}]   ;;  %s2719_s6 = inlined_call_operand.hbm [shape: f32[1,1,8], index: 6, kind: output, shape index: {}]  }
   0x1   :  { %v26_v0 = vld [vmem:[%s2714_s1 + $0x8] sm:$0xff]  ;;  %v36_v1 = vld [vmem:[%s2714_s1 + $0x58] sm:$0xff]  ;;  %v25_v5 = vld [vmem:[%s2714_s1] sm:$0xff]  ;;  %297 = vmatprep.mubr.f32.mxu0 %v1688_v7  ;;  %368 = vmatprep.mubr.f32.mxu1 %v1688_v7 }
   0x2   :  { %v28_v2 = vld [vmem:[%s2714_s1 + $0x18] sm:$0xff]  ;;  %v1356_v3 = vpack.c.bf16 %v36_v1, %v26_v0  ;;  %v38_v4 = vld [vmem:[%s2714_s1 + $0x68] sm:$0xff]  ;;  %v35_v6 = vld [vmem:[%s2714_s1 + $0x50] sm:$0xff] }
   0x3   :  { %v1384_v8 = vpack.c.bf16 %v38_v4, %v28_v2  ;;  %v1358_v9 = vpack.c.bf16 %v35_v6, %v25_v5  ;;  %v27_v10 = vld [vmem:[%s2714_s1 + $0x10] sm:$0xff]  ;;  %v37_v11 = vld [vmem:[%s2714_s1 + $0x60] sm:$0xff]  ;;  %v46_v12 = vld [vmem:[%s2714_s1 + $0xa8] sm:$0xff] }
   0x4   :  { %1357 = vmatprep.subr.bf16.mxu0 %v1356_v3  ;;  %v1386_v13 = vpack.c.bf16 %v37_v11, %v27_v10  ;;  %v56_v14 = vld [vmem:[%s2714_s1 + $0xf8] sm:$0xff]  ;;  %v58_v16 = vld [vmem:[%s2714_s1 + $0x108] sm:$0xff]  ;;  %v45_v19 = vld [vmem:[%s2714_s1 + $0xa0] sm:$0xff] }
   0x5   :  { %v48_v15 = vld [vmem:[%s2714_s1 + $0xb8] sm:$0xff]  ;;  %1385 = vmatprep.subr.bf16.mxu1 %v1384_v8  ;;  %1359 = vmatpush1.bf16.msra.mxu0 %v1358_v9  ;;  %v1360_v17 = vpack.c.bf16 %v56_v14, %v46_v12  ;;  %v55_v20 = vld [vmem:[%s2714_s1 + $0xf0] sm:$0xff]  ;;  %v57_v23 = vld [vmem:[%s2714_s1 + $0x100] sm:$0xff] }
   0x6   :  { %v1388_v18 = vpack.c.bf16 %v58_v16, %v48_v15  ;;  %v47_v21 = vld [vmem:[%s2714_s1 + $0xb0] sm:$0xff]  ;;  %1387 = vmatpush1.bf16.msra.mxu1 %v1386_v13  ;;  %v1362_v22 = vpack.c.bf16 %v55_v20, %v45_v19  ;;  %v66_v24 = vld [vmem:[%s2714_s1 + $0x148] sm:$0xff]  ;;  %v76_v25 = vld [vmem:[%s2714_s1 + $0x198] sm:$0xff] }
   0x7   :  { %1361 = vmatprep.subr.bf16.mxu0 %v1360_v17  ;;  %v1390_v26 = vpack.c.bf16 %v57_v23, %v47_v21  ;;  %v1364_v27 = vpack.c.bf16 %v76_v25, %v66_v24  ;;  %v68_v28 = vld [vmem:[%s2714_s1 + $0x158] sm:$0xff]  ;;  %v78_v29 = vld [vmem:[%s2714_s1 + $0x1a8] sm:$0xff]  ;;  %v65_v30 = vld [vmem:[%s2714_s1 + $0x140] sm:$0xff] }
   0x8   :  { %1389 = vmatprep.subr.bf16.mxu1 %v1388_v18  ;;  %v1392_v31 = vpack.c.bf16 %v78_v29, %v68_v28  ;;  %v75_v32 = vld [vmem:[%s2714_s1 + $0x190] sm:$0xff]  ;;  %v77_v34 = vld [vmem:[%s2714_s1 + $0x1a0] sm:$0xff]  ;;  %v86_v36 = vld [vmem:[%s2714_s1 + $0x1e8] sm:$0xff] }
   0x9   :  { %v67_v33 = vld [vmem:[%s2714_s1 + $0x150] sm:$0xff]  ;;  %1363 = vmatpush1.bf16.msra.mxu0 %v1362_v22  ;;  %v1366_v35 = vpack.c.bf16 %v75_v32, %v65_v30  ;;  %v96_v37 = vld [vmem:[%s2714_s1 + $0x238] sm:$0xff]  ;;  %v98_v41 = vld [vmem:[%s2714_s1 + $0x248] sm:$0xff] }
   0xa   :  { %v88_v38 = vld [vmem:[%s2714_s1 + $0x1f8] sm:$0xff]  ;;  %1391 = vmatpush1.bf16.msra.mxu1 %v1390_v26  ;;  %1365 = vmatprep.subr.bf16.mxu0 %v1364_v27  ;;  %v1394_v39 = vpack.c.bf16 %v77_v34, %v67_v33  ;;  %v1368_v40 = vpack.c.bf16 %v96_v37, %v86_v36  ;;  %v85_v42 = vld [vmem:[%s2714_s1 + $0x1e0] sm:$0xff]  ;;  %v95_v43 = vld [vmem:[%s2714_s1 + $0x230] sm:$0xff] }
   0xb   :  { %1393 = vmatprep.subr.bf16.mxu1 %v1392_v31  ;;  %v1396_v44 = vpack.c.bf16 %v98_v41, %v88_v38  ;;  %v87_v45 = vld [vmem:[%s2714_s1 + $0x1f0] sm:$0xff]  ;;  %v97_v46 = vld [vmem:[%s2714_s1 + $0x240] sm:$0xff]  ;;  %v106_v47 = vld [vmem:[%s2714_s1 + $0x288] sm:$0xff]  ;;  %v1370_v51 = vpack.c.bf16 %v95_v43, %v85_v42 }
   0xc   :  { %v116_v48 = vld [vmem:[%s2714_s1 + $0x2d8] sm:$0xff]  ;;  %v118_v50 = vld [vmem:[%s2714_s1 + $0x2e8] sm:$0xff]  ;;  %v1398_v52 = vpack.c.bf16 %v97_v46, %v87_v45  ;;  %v105_v54 = vld [vmem:[%s2714_s1 + $0x280] sm:$0xff] }
   0xd   :  { %v108_v49 = vld [vmem:[%s2714_s1 + $0x298] sm:$0xff]  ;;  %1367 = vmatpush1.bf16.msra.mxu0 %v1366_v35  ;;  %v1372_v53 = vpack.c.bf16 %v116_v48, %v106_v47  ;;  %v115_v55 = vld [vmem:[%s2714_s1 + $0x2d0] sm:$0xff]  ;;  %v117_v58 = vld [vmem:[%s2714_s1 + $0x2e0] sm:$0xff] }
   0xe   :  { %1395 = vmatpush1.bf16.msra.mxu1 %v1394_v39  ;;  %1369 = vmatprep.subr.bf16.mxu0 %v1368_v40  ;;  %v107_v56 = vld [vmem:[%s2714_s1 + $0x290] sm:$0xff]  ;;  %v1400_v57 = vpack.c.bf16 %v118_v50, %v108_v49  ;;  %v126_v59 = vld [vmem:[%s2714_s1 + $0x328] sm:$0xff]  ;;  %v136_v60 = vld [vmem:[%s2714_s1 + $0x378] sm:$0xff]  ;;  %v1374_v63 = vpack.c.bf16 %v115_v55, %v105_v54 }
   0xf   :  { %1397 = vmatprep.subr.bf16.mxu1 %v1396_v44  ;;  %v128_v61 = vld [vmem:[%s2714_s1 + $0x338] sm:$0xff]  ;;  %v138_v62 = vld [vmem:[%s2714_s1 + $0x388] sm:$0xff]  ;;  %v1402_v0 = vpack.c.bf16 %v117_v58, %v107_v56  ;;  %v1376_v1 = vpack.c.bf16 %v136_v60, %v126_v59  ;;  %v125_v2 = vld [vmem:[%s2714_s1 + $0x320] sm:$0xff] }
  0x10   :  { %v135_v3 = vld [vmem:[%s2714_s1 + $0x370] sm:$0xff]  ;;  %v1404_v5 = vpack.c.bf16 %v138_v62, %v128_v61  ;;  %v137_v6 = vld [vmem:[%s2714_s1 + $0x380] sm:$0xff]  ;;  %v146_v8 = vld [vmem:[%s2714_s1 + $0x3c8] sm:$0xff] }
  0x11   :  { %1371 = vmatpush1.bf16.msra.mxu0 %v1370_v51  ;;  %v127_v4 = vld [vmem:[%s2714_s1 + $0x330] sm:$0xff]  ;;  %v156_v9 = vld [vmem:[%s2714_s1 + $0x418] sm:$0xff]  ;;  %v158_v11 = vld [vmem:[%s2714_s1 + $0x428] sm:$0xff]  ;;  %v1378_v12 = vpack.c.bf16 %v135_v3, %v125_v2 }
  0x12   :  { %1399 = vmatpush1.bf16.msra.mxu1 %v1398_v52  ;;  %1373 = vmatprep.subr.bf16.mxu0 %v1372_v53  ;;  %v148_v10 = vld [vmem:[%s2714_s1 + $0x3d8] sm:$0xff]  ;;  %v1406_v13 = vpack.c.bf16 %v137_v6, %v127_v4  ;;  %v1380_v14 = vpack.c.bf16 %v156_v9, %v146_v8  ;;  %v145_v15 = vld [vmem:[%s2714_s1 + $0x3c0] sm:$0xff]  ;;  %v155_v16 = vld [vmem:[%s2714_s1 + $0x410] sm:$0xff] }
  0x13   :  { %1401 = vmatprep.subr.bf16.mxu1 %v1400_v57  ;;  %v1408_v17 = vpack.c.bf16 %v158_v11, %v148_v10  ;;  %v147_v18 = vld [vmem:[%s2714_s1 + $0x3d0] sm:$0xff]  ;;  %v157_v19 = vld [vmem:[%s2714_s1 + $0x420] sm:$0xff]  ;;  %v1382_v20 = vpack.c.bf16 %v155_v16, %v145_v15  ;;  %v166_v22 = vld [vmem:[%s2714_s1 + $0x468] sm:$0xff] }
  0x14   :  { %v1410_v21 = vpack.c.bf16 %v157_v19, %v147_v18  ;;  %v168_v23 = vld [vmem:[%s2714_s1 + $0x478] sm:$0xff]  ;;  %v30_v24 = vld [vmem:[%s2714_s1 + $0x28] sm:$0xff]  ;;  %v165_v25 = vld [vmem:[%s2714_s1 + $0x460] sm:$0xff] }
  0x15   :  { %1375 = vmatpush1.bf16.msra.mxu0 %v1374_v63  ;;  %v40_v26 = vld [vmem:[%s2714_s1 + $0x78] sm:$0xff]  ;;  %v29_v27 = vld [vmem:[%s2714_s1 + $0x20] sm:$0xff]  ;;  %v39_v28 = vld [vmem:[%s2714_s1 + $0x70] sm:$0xff] }
  0x16   :  { %1403 = vmatpush1.bf16.msra.mxu1 %v1402_v0  ;;  %1377 = vmatprep.subr.bf16.mxu0 %v1376_v1  ;;  %v167_v29 = vld [vmem:[%s2714_s1 + $0x470] sm:$0xff]  ;;  %v32_v30 = vld [vmem:[%s2714_s1 + $0x38] sm:$0xff]  ;;  %v42_v31 = vld [vmem:[%s2714_s1 + $0x88] sm:$0xff]  ;;  %v1412_v37 = vpack.c.bf16 %v40_v26, %v30_v24  ;;  %v1414_v40 = vpack.c.bf16 %v39_v28, %v29_v27 }
  0x17   :  { %1405 = vmatprep.subr.bf16.mxu1 %v1404_v5  ;;  %v31_v32 = vld [vmem:[%s2714_s1 + $0x30] sm:$0xff]  ;;  %v41_v33 = vld [vmem:[%s2714_s1 + $0x80] sm:$0xff]  ;;  %v50_v34 = vld [vmem:[%s2714_s1 + $0xc8] sm:$0xff]  ;;  %v1440_v41 = vpack.c.bf16 %v42_v31, %v32_v30 }
  0x18   :  { %v60_v35 = vld [vmem:[%s2714_s1 + $0x118] sm:$0xff]  ;;  %v1943_v36 = vld [vmem:[%s2713_s0] sm:$0xff]  ;;  %v62_v39 = vld [vmem:[%s2714_s1 + $0x128] sm:$0xff]  ;;  %v1442_v42 = vpack.c.bf16 %v41_v33, %v31_v32 }
  0x19   :  { %1379 = vmatpush1.bf16.msra.mxu0 %v1378_v12  ;;  %v52_v38 = vld [vmem:[%s2714_s1 + $0xd8] sm:$0xff]  ;;  %v1416_v43 = vpack.c.bf16 %v60_v35, %v50_v34  ;;  %v49_v44 = vld [vmem:[%s2714_s1 + $0xc0] sm:$0xff]  ;;  %v59_v45 = vld [vmem:[%s2714_s1 + $0x110] sm:$0xff] }
  0x1a   :  { %1407 = vmatpush1.bf16.msra.mxu1 %v1406_v13  ;;  %1381 = vmatprep.subr.bf16.mxu0 %v1380_v14  ;;  %v51_v46 = vld [vmem:[%s2714_s1 + $0xd0] sm:$0xff]  ;;  %v1444_v47 = vpack.c.bf16 %v62_v39, %v52_v38  ;;  %v61_v48 = vld [vmem:[%s2714_s1 + $0x120] sm:$0xff]  ;;  %v70_v49 = vld [vmem:[%s2714_s1 + $0x168] sm:$0xff]  ;;  %v1418_v53 = vpack.c.bf16 %v59_v45, %v49_v44 }
  0x1b   :  { %1409 = vmatprep.subr.bf16.mxu1 %v1408_v17  ;;  %v80_v50 = vld [vmem:[%s2714_s1 + $0x1b8] sm:$0xff]  ;;  %v82_v52 = vld [vmem:[%s2714_s1 + $0x1c8] sm:$0xff]  ;;  %v1446_v54 = vpack.c.bf16 %v61_v48, %v51_v46  ;;  %v69_v56 = vld [vmem:[%s2714_s1 + $0x160] sm:$0xff] }
  0x1c   :  { %v72_v51 = vld [vmem:[%s2714_s1 + $0x178] sm:$0xff]  ;;  %v1420_v55 = vpack.c.bf16 %v80_v50, %v70_v49  ;;  %v79_v57 = vld [vmem:[%s2714_s1 + $0x1b0] sm:$0xff]  ;;  %v81_v60 = vld [vmem:[%s2714_s1 + $0x1c0] sm:$0xff] }
  0x1d   :  { %1383 = vmatpush1.bf16.msra.mxu0 %v1382_v20  ;;  %v71_v58 = vld [vmem:[%s2714_s1 + $0x170] sm:$0xff]  ;;  %v1448_v59 = vpack.c.bf16 %v82_v52, %v72_v51  ;;  %v90_v61 = vld [vmem:[%s2714_s1 + $0x208] sm:$0xff]  ;;  %v100_v62 = vld [vmem:[%s2714_s1 + $0x258] sm:$0xff]  ;;  %v1422_v1 = vpack.c.bf16 %v79_v57, %v69_v56 }
  0x1e   :  { %1411 = vmatpush1.bf16.msra.mxu1 %v1410_v21  ;;  %261 = vmatprep.subr.mxu0 %v166_v22  ;;  %v92_v63 = vld [vmem:[%s2714_s1 + $0x218] sm:$0xff]  ;;  %v102_v0 = vld [vmem:[%s2714_s1 + $0x268] sm:$0xff]  ;;  %v1450_v2 = vpack.c.bf16 %v81_v60, %v71_v58  ;;  %v1424_v3 = vpack.c.bf16 %v100_v62, %v90_v61  ;;  %v89_v4 = vld [vmem:[%s2714_s1 + $0x200] sm:$0xff] }
  0x1f   :  { %332 = vmatprep.subr.mxu1 %v168_v23  ;;  %v99_v5 = vld [vmem:[%s2714_s1 + $0x250] sm:$0xff]  ;;  %v1452_v8 = vpack.c.bf16 %v102_v0, %v92_v63  ;;  %v101_v9 = vld [vmem:[%s2714_s1 + $0x260] sm:$0xff]  ;;  %v110_v10 = vld [vmem:[%s2714_s1 + $0x2a8] sm:$0xff] }
  0x20   :  { %v91_v6 = vld [vmem:[%s2714_s1 + $0x210] sm:$0xff]  ;;  %v120_v11 = vld [vmem:[%s2714_s1 + $0x2f8] sm:$0xff]  ;;  %v122_v13 = vld [vmem:[%s2714_s1 + $0x308] sm:$0xff]  ;;  %v1426_v14 = vpack.c.bf16 %v99_v5, %v89_v4 }
  0x21   :  { %262 = vmatpush1.msra.mxu0 %v165_v25  ;;  %v112_v12 = vld [vmem:[%s2714_s1 + $0x2b8] sm:$0xff]  ;;  %v1454_v15 = vpack.c.bf16 %v101_v9, %v91_v6  ;;  %v1428_v16 = vpack.c.bf16 %v120_v11, %v110_v10  ;;  %v109_v17 = vld [vmem:[%s2714_s1 + $0x2a0] sm:$0xff]  ;;  %v119_v18 = vld [vmem:[%s2714_s1 + $0x2f0] sm:$0xff] }
  0x22   :  { %333 = vmatpush1.msra.mxu1 %v167_v29  ;;  %1201 = vmatmul.mubr.msk.f32.vlgmr.msra.gmra.mrb[0].mxu0 %vm229_vm0, %v1943_v36  ;;  %v111_v19 = vld [vmem:[%s2714_s1 + $0x2b0] sm:$0xff]  ;;  %v1456_v20 = vpack.c.bf16 %v122_v13, %v112_v12  ;;  %v121_v21 = vld [vmem:[%s2714_s1 + $0x300] sm:$0xff]  ;;  %v130_v22 = vld [vmem:[%s2714_s1 + $0x348] sm:$0xff]  ;;  %v1430_v26 = vpack.c.bf16 %v119_v18, %v109_v17 }
  0x23   :  { %1202 = vmatmul.mubr.msk.f32.vlgmr.msra.gmra.mrb[0].mxu1 %vm229_vm0, %v1943_v36  ;;  %1413 = vmatprep.subr.bf16.mxu0 %v1412_v37  ;;  %v140_v23 = vld [vmem:[%s2714_s1 + $0x398] sm:$0xff]  ;;  %v142_v25 = vld [vmem:[%s2714_s1 + $0x3a8] sm:$0xff]  ;;  %v1458_v27 = vpack.c.bf16 %v121_v21, %v111_v19  ;;  %v129_v29 = vld [vmem:[%s2714_s1 + $0x340] sm:$0xff] }
  0x24   :  { %1415 = vmatpush1.bf16.msra.mxu0 %v1414_v40  ;;  %1441 = vmatprep.subr.bf16.mxu1 %v1440_v41  ;;  %v132_v24 = vld [vmem:[%s2714_s1 + $0x358] sm:$0xff]  ;;  %v1432_v28 = vpack.c.bf16 %v140_v23, %v130_v22  ;;  %v139_v30 = vld [vmem:[%s2714_s1 + $0x390] sm:$0xff]  ;;  %v141_v33 = vld [vmem:[%s2714_s1 + $0x3a0] sm:$0xff] }
  0x25   :  { %1443 = vmatpush1.bf16.msra.mxu1 %v1442_v42  ;;  %1417 = vmatprep.subr.bf16.mxu0 %v1416_v43  ;;  %v131_v31 = vld [vmem:[%s2714_s1 + $0x350] sm:$0xff]  ;;  %v1460_v32 = vpack.c.bf16 %v142_v25, %v132_v24  ;;  %v150_v34 = vld [vmem:[%s2714_s1 + $0x3e8] sm:$0xff]  ;;  %v160_v35 = vld [vmem:[%s2714_s1 + $0x438] sm:$0xff]  ;;  %v1434_v39 = vpack.c.bf16 %v139_v30, %v129_v29 }
  0x26   :  { %1445 = vmatprep.subr.bf16.mxu1 %v1444_v47  ;;  %439 = vmatprep.mubr.f32.mxu0 %v1688_v7  ;;  %v152_v37 = vld [vmem:[%s2714_s1 + $0x3f8] sm:$0xff]  ;;  %v162_v38 = vld [vmem:[%s2714_s1 + $0x448] sm:$0xff]  ;;  %v1462_v40 = vpack.c.bf16 %v141_v33, %v131_v31  ;;  %v1436_v41 = vpack.c.bf16 %v160_v35, %v150_v34  ;;  %v149_v42 = vld [vmem:[%s2714_s1 + $0x3e0] sm:$0xff] }
  0x27   :  { %510 = vmatprep.mubr.f32.mxu1 %v1688_v7  ;;  %v159_v43 = vld [vmem:[%s2714_s1 + $0x430] sm:$0xff]  ;;  %v1464_v44 = vpack.c.bf16 %v162_v38, %v152_v37  ;;  %v161_v46 = vld [vmem:[%s2714_s1 + $0x440] sm:$0xff]  ;;  %v170_v49 = vld [vmem:[%s2714_s1 + $0x488] sm:$0xff] }
  0x28   :  { %1419 = vmatpush1.bf16.msra.mxu0 %v1418_v53  ;;  %v151_v45 = vld [vmem:[%s2714_s1 + $0x3f0] sm:$0xff]  ;;  %v1438_v47 = vpack.c.bf16 %v159_v43, %v149_v42  ;;  %v169_v50 = vld [vmem:[%s2714_s1 + $0x480] sm:$0xff]  ;;  %v172_v51 = vld [vmem:[%s2714_s1 + $0x498] sm:$0xff] }
  0x29   :  { %1447 = vmatpush1.bf16.msra.mxu1 %v1446_v54  ;;  %1421 = vmatprep.subr.bf16.mxu0 %v1420_v55  ;;  %v1466_v48 = vpack.c.bf16 %v161_v46, %v151_v45  ;;  %v34_v52 = vld [vmem:[%s2714_s1 + $0x48] sm:$0xff]  ;;  %v44_v53 = vld [vmem:[%s2714_s1 + $0x98] sm:$0xff]  ;;  %v33_v54 = vld [vmem:[%s2714_s1 + $0x40] sm:$0xff] }
  0x2a   :  { %1449 = vmatprep.subr.bf16.mxu1 %v1448_v59  ;;  %v43_v55 = vld [vmem:[%s2714_s1 + $0x90] sm:$0xff]  ;;  %v54_v56 = vld [vmem:[%s2714_s1 + $0xe8] sm:$0xff]  ;;  %v64_v57 = vld [vmem:[%s2714_s1 + $0x138] sm:$0xff]  ;;  %v1468_v61 = vpack.c.bf16 %v44_v53, %v34_v52 }
  0x2b   :  { %v614_v58 = vld [vmem:[%s2716_s3 + $0x80] sm:$0xff]  ;;  %v615_v59 = vld [vmem:[%s2716_s3 + $0x88] sm:$0xff]  ;;  %v171_v60 = vld [vmem:[%s2714_s1 + $0x490] sm:$0xff]  ;;  %v1470_v0 = vpack.c.bf16 %v43_v55, %v33_v54 }
  0x2c   :  { %1423 = vmatpush1.bf16.msra.mxu0 %v1422_v1  ;;  %v598_v62 = vld [vmem:[%s2716_s3] sm:$0xff]  ;;  %v599_v63 = vld [vmem:[%s2716_s3 + $0x8] sm:$0xff]  ;;  %v616_v1 = vld [vmem:[%s2716_s3 + $0x90] sm:$0xff]  ;;  %v1496_v6 = vpack.c.bf16 %v615_v59, %v614_v58 }
  0x2d   :  { %1451 = vmatpush1.bf16.msra.mxu1 %v1450_v2  ;;  %1425 = vmatprep.subr.bf16.mxu0 %v1424_v3  ;;  %v617_v2 = vld [vmem:[%s2716_s3 + $0x98] sm:$0xff]  ;;  %v1472_v3 = vpack.c.bf16 %v64_v57, %v54_v56  ;;  %v53_v4 = vld [vmem:[%s2714_s1 + $0xe0] sm:$0xff]  ;;  %v63_v5 = vld [vmem:[%s2714_s1 + $0x130] sm:$0xff]  ;;  %v1498_v10 = vpack.c.bf16 %v599_v63, %v598_v62 }
  0x2e   :  { %1453 = vmatprep.subr.bf16.mxu1 %v1452_v8  ;;  %v74_v8 = vld [vmem:[%s2714_s1 + $0x188] sm:$0xff]  ;;  %v84_v9 = vld [vmem:[%s2714_s1 + $0x1d8] sm:$0xff]  ;;  %v1500_v11 = vpack.c.bf16 %v617_v2, %v616_v1  ;;  %v600_v12 = vld [vmem:[%s2716_s3 + $0x10] sm:$0xff] }
  0x2f   :  { %v601_v13 = vld [vmem:[%s2716_s3 + $0x18] sm:$0xff]  ;;  %v1476_v17 = vpack.c.bf16 %v84_v9, %v74_v8  ;;  %v73_v18 = vld [vmem:[%s2714_s1 + $0x180] sm:$0xff]  ;;  %v83_v19 = vld [vmem:[%s2714_s1 + $0x1d0] sm:$0xff] }
  0x30   :  { %1427 = vmatpush1.bf16.msra.mxu0 %v1426_v14  ;;  %v1474_v14 = vpack.c.bf16 %v63_v5, %v53_v4  ;;  %v104_v21 = vld [vmem:[%s2714_s1 + $0x278] sm:$0xff]  ;;  %v1502_v22 = vpack.c.bf16 %v601_v13, %v600_v12 }
  0x31   :  { %1455 = vmatpush1.bf16.msra.mxu1 %v1454_v15  ;;  %1429 = vmatprep.subr.bf16.mxu0 %v1428_v16  ;;  %v618_v15 = vld [vmem:[%s2716_s3 + $0xa0] sm:$0xff]  ;;  %v619_v16 = vld [vmem:[%s2716_s3 + $0xa8] sm:$0xff] }
  0x32   :  { %1457 = vmatprep.subr.bf16.mxu1 %v1456_v20  ;;  %v94_v20 = vld [vmem:[%s2714_s1 + $0x228] sm:$0xff] }
  0x34   :  { %1431 = vmatpush1.bf16.msra.mxu0 %v1430_v26 }
  0x35   :  { %1459 = vmatpush1.bf16.msra.mxu1 %v1458_v27  ;;  %1433 = vmatprep.subr.bf16.mxu0 %v1432_v28 }
  0x36   :  { %1461 = vmatprep.subr.bf16.mxu1 %v1460_v32 }
  0x38   :  { %1435 = vmatpush1.bf16.msra.mxu0 %v1434_v39 }
  0x39   :  { %1463 = vmatpush1.bf16.msra.mxu1 %v1462_v40  ;;  %1437 = vmatprep.subr.bf16.mxu0 %v1436_v41 }
  0x3a   :  { %1465 = vmatprep.subr.bf16.mxu1 %v1464_v44 }
  0x3c   :  { %1439 = vmatpush1.bf16.msra.mxu0 %v1438_v47 }
  0x3d   :  { %1467 = vmatpush1.bf16.msra.mxu1 %v1466_v48  ;;  %403 = vmatprep.subr.mxu0 %v170_v49 }
  0x3e   :  { %474 = vmatprep.subr.mxu1 %v172_v51 }
  0x40   :  { %404 = vmatpush1.msra.mxu0 %v169_v50 }
  0x41   :  { %1203 = vmatmul.mubr.msk.f32.vlgmr.msra.gmra.mrb[2].mxu0 %vm229_vm0, %v1943_v36  ;;  %475 = vmatpush1.msra.mxu1 %v171_v60 }
  0x42   :  { %1204 = vmatmul.mubr.msk.f32.vlgmr.msra.gmra.mrb[2].mxu1 %vm229_vm0, %v1943_v36  ;;  %1469 = vmatprep.subr.bf16.mxu0 %v1468_v61 }
  0x43   :  { %1471 = vmatpush1.bf16.msra.mxu0 %v1470_v0  ;;  %581 = vmatprep.mubr.f32.mxu0 %v1688_v7 }
  0x44   :  { %1473 = vmatprep.subr.bf16.mxu0 %v1472_v3  ;;  %1497 = vmatprep.subr.bf16.mxu1 %v1496_v6 }
  0x45   :  { %1499 = vmatpush3.bf16.msra.mxu1 %v1498_v10 }
  0x46   :  { %11 = vsyncpa [#allocation3], 0  ;;  %1501 = vmatprep.subr.bf16.mxu1 %v1500_v11  ;;  %v1504_v23 = vpack.c.bf16 %v619_v16, %v618_v15  ;;  %v602_v24 = vld [vmem:[%s2716_s3 + $0x20] sm:$0xff]  ;;  %v603_v25 = vld [vmem:[%s2716_s3 + $0x28] sm:$0xff]  ;;  %v1478_v26 = vpack.c.bf16 %v83_v19, %v73_v18  ;;  %v1480_v29 = vpack.c.bf16 %v104_v21, %v94_v20  ;;  %vm748_vm1 = vcmask 392192   ;;  %s1692_s25 = smov [#allocation2]  }
  0x47   :  { %1475 = vmatpush1.bf16.msra.mxu0 %v1474_v14  ;;  %v620_v27 = vld [vmem:[%s2716_s3 + $0xb0] sm:$0xff]  ;;  %v621_v28 = vld [vmem:[%s2716_s3 + $0xb8] sm:$0xff]  ;;  %v93_v30 = vld [vmem:[%s2714_s1 + $0x220] sm:$0xff]  ;;  %v1506_v34 = vpack.c.bf16 %v603_v25, %v602_v24  ;;  %vm1690_vm2 = vmmov 0   ;;  %vm1108_vm3 = vcmask 326656   ;;  %s1193_s26 = sshll.u32 %s1692_s25, 4  ;;  %s1194_s26 = int_to_ptr.vmem [resolvable:$true] %s1193_s26 }
  0x48   :  { %1477 = vmatprep.subr.bf16.mxu0 %v1476_v17  ;;  %v103_v31 = vld [vmem:[%s2714_s1 + $0x270] sm:$0xff]  ;;  %v114_v32 = vld [vmem:[%s2714_s1 + $0x2c8] sm:$0xff]  ;;  %v124_v33 = vld [vmem:[%s2714_s1 + $0x318] sm:$0xff]  ;;  %v1508_v35 = vpack.c.bf16 %v621_v28, %v620_v27  ;;  %vm1185_vm4 = vcmask 57344   ;;  %s1664_s27 = scalar_lea.vmem %s1194_s26, 16  ;;  %p1669_p1 = scmp.lt.s32.totalorder %s1194_s26, %s1194_s26 }
  0x49   :  { %1503 = vmatpush3.bf16.msra.mxu1 %v1502_v22  ;;  %v604_v37 = vld [vmem:[%s2716_s3 + $0x30] sm:$0xff]  ;;  %v605_v38 = vld [vmem:[%s2716_s3 + $0x38] sm:$0xff]  ;;  %v1482_v39 = vpack.c.bf16 %v103_v31, %v93_v30  ;;  %v622_v40 = vld [vmem:[%s2716_s3 + $0xc0] sm:$0xff]  ;;  %v1484_v42 = vpack.c.bf16 %v124_v33, %v114_v32  ;;  %p1665_p0 = scmp.ne.s32.totalorder %s1194_s26, %s1664_s27 }
  0x4a   :  { %1505 = vmatprep.subr.bf16.mxu1 %v1504_v23  ;;  %v623_v41 = vld [vmem:[%s2716_s3 + $0xc8] sm:$0xff]  ;;  %v113_v43 = vld [vmem:[%s2714_s1 + $0x2c0] sm:$0xff]  ;;  %v123_v44 = vld [vmem:[%s2714_s1 + $0x310] sm:$0xff]  ;;  %v1510_v47 = vpack.c.bf16 %v605_v38, %v604_v37 }
  0x4b   :  { %1479 = vmatpush1.bf16.msra.mxu0 %v1478_v26  ;;  %v134_v45 = vld [vmem:[%s2714_s1 + $0x368] sm:$0xff]  ;;  %v144_v46 = vld [vmem:[%s2714_s1 + $0x3b8] sm:$0xff]  ;;  %v1512_v48 = vpack.c.bf16 %v623_v41, %v622_v40  ;;  %v606_v49 = vld [vmem:[%s2716_s3 + $0x40] sm:$0xff]  ;;  %v1486_v51 = vpack.c.bf16 %v123_v44, %v113_v43 }
  0x4c   :  { %1481 = vmatprep.subr.bf16.mxu0 %v1480_v29  ;;  %v607_v50 = vld [vmem:[%s2716_s3 + $0x48] sm:$0xff]  ;;  %v624_v52 = vld [vmem:[%s2716_s3 + $0xd0] sm:$0xff]  ;;  %v625_v53 = vld [vmem:[%s2716_s3 + $0xd8] sm:$0xff]  ;;  %v1488_v54 = vpack.c.bf16 %v144_v46, %v134_v45 }
  0x4d   :  { %1507 = vmatpush3.bf16.msra.mxu1 %v1506_v34  ;;  %v133_v55 = vld [vmem:[%s2714_s1 + $0x360] sm:$0xff]  ;;  %v143_v56 = vld [vmem:[%s2714_s1 + $0x3b0] sm:$0xff]  ;;  %v154_v57 = vld [vmem:[%s2714_s1 + $0x408] sm:$0xff]  ;;  %v1514_v59 = vpack.c.bf16 %v607_v50, %v606_v49  ;;  %v1516_v60 = vpack.c.bf16 %v625_v53, %v624_v52 }
  0x4e   :  { %1509 = vmatprep.subr.bf16.mxu1 %v1508_v35  ;;  %v164_v58 = vld [vmem:[%s2714_s1 + $0x458] sm:$0xff]  ;;  %v608_v61 = vld [vmem:[%s2716_s3 + $0x50] sm:$0xff]  ;;  %v1490_v63 = vpack.c.bf16 %v143_v56, %v133_v55  ;;  %v626_v0 = vld [vmem:[%s2716_s3 + $0xe0] sm:$0xff] }
  0x4f   :  { %1483 = vmatpush1.bf16.msra.mxu0 %v1482_v39  ;;  %v609_v62 = vld [vmem:[%s2716_s3 + $0x58] sm:$0xff]  ;;  %v627_v1 = vld [vmem:[%s2716_s3 + $0xe8] sm:$0xff]  ;;  %v1492_v2 = vpack.c.bf16 %v164_v58, %v154_v57  ;;  %v153_v3 = vld [vmem:[%s2714_s1 + $0x400] sm:$0xff] }
  0x50   :  { %1485 = vmatprep.subr.bf16.mxu0 %v1484_v42  ;;  %v163_v4 = vld [vmem:[%s2714_s1 + $0x450] sm:$0xff]  ;;  %v1518_v5 = vpack.c.bf16 %v609_v62, %v608_v61  ;;  %v1520_v6 = vpack.c.bf16 %v627_v1, %v626_v0  ;;  %v610_v8 = vld [vmem:[%s2716_s3 + $0x60] sm:$0xff]  ;;  %v611_v9 = vld [vmem:[%s2716_s3 + $0x68] sm:$0xff] }
  0x51   :  { %1511 = vmatpush3.bf16.msra.mxu1 %v1510_v47  ;;  %v1494_v10 = vpack.c.bf16 %v163_v4, %v153_v3  ;;  %v174_v11 = vld [vmem:[%s2714_s1 + $0x4a8] sm:$0xff]  ;;  %v646_v12 = vld [vmem:[%s2716_s3 + $0x180] sm:$0xff]  ;;  %v1522_v14 = vpack.c.bf16 %v611_v9, %v610_v8  ;;  %v648_v17 = vld [vmem:[%s2716_s3 + $0x190] sm:$0xff] }
  0x52   :  { %1513 = vmatprep.subr.bf16.mxu1 %v1512_v48  ;;  %v647_v13 = vld [vmem:[%s2716_s3 + $0x188] sm:$0xff]  ;;  %v630_v15 = vld [vmem:[%s2716_s3 + $0x100] sm:$0xff]  ;;  %v649_v18 = vld [vmem:[%s2716_s3 + $0x198] sm:$0xff] }
  0x53   :  { %1487 = vmatpush1.bf16.msra.mxu0 %v1486_v51  ;;  %v631_v16 = vld [vmem:[%s2716_s3 + $0x108] sm:$0xff]  ;;  %v173_v19 = vld [vmem:[%s2714_s1 + $0x4a0] sm:$0xff]  ;;  %v1528_v20 = vpack.c.bf16 %v647_v13, %v646_v12  ;;  %v1532_v22 = vpack.c.bf16 %v649_v18, %v648_v17  ;;  %v632_v23 = vld [vmem:[%s2716_s3 + $0x110] sm:$0xff] }
  0x54   :  { %1489 = vmatprep.subr.bf16.mxu0 %v1488_v54  ;;  %v1530_v21 = vpack.c.bf16 %v631_v16, %v630_v15  ;;  %v633_v24 = vld [vmem:[%s2716_s3 + $0x118] sm:$0xff]  ;;  %v650_v25 = vld [vmem:[%s2716_s3 + $0x1a0] sm:$0xff]  ;;  %v651_v26 = vld [vmem:[%s2716_s3 + $0x1a8] sm:$0xff] }
  0x55   :  { %1515 = vmatpush3.bf16.msra.mxu1 %v1514_v59  ;;  %v1534_v27 = vpack.c.bf16 %v633_v24, %v632_v23  ;;  %v1536_v28 = vpack.c.bf16 %v651_v26, %v650_v25  ;;  %v634_v29 = vld [vmem:[%s2716_s3 + $0x120] sm:$0xff]  ;;  %v635_v30 = vld [vmem:[%s2716_s3 + $0x128] sm:$0xff]  ;;  %v652_v31 = vld [vmem:[%s2716_s3 + $0x1b0] sm:$0xff] }
  0x56   :  { %1517 = vmatprep.subr.bf16.mxu1 %v1516_v60  ;;  %v1538_v32 = vpack.c.bf16 %v635_v30, %v634_v29  ;;  %v636_v34 = vld [vmem:[%s2716_s3 + $0x130] sm:$0xff]  ;;  %v637_v35 = vld [vmem:[%s2716_s3 + $0x138] sm:$0xff]  ;;  %v654_v37 = vld [vmem:[%s2716_s3 + $0x1c0] sm:$0xff] }
  0x57   :  { %1491 = vmatpush1.bf16.msra.mxu0 %v1490_v63  ;;  %v655_v38 = vld [vmem:[%s2716_s3 + $0x1c8] sm:$0xff]  ;;  %v1542_v39 = vpack.c.bf16 %v637_v35, %v636_v34  ;;  %v638_v41 = vld [vmem:[%s2716_s3 + $0x140] sm:$0xff]  ;;  %v656_v43 = vld [vmem:[%s2716_s3 + $0x1d0] sm:$0xff] }
  0x58   :  { %1493 = vmatprep.subr.bf16.mxu0 %v1492_v2  ;;  %v1544_v40 = vpack.c.bf16 %v655_v38, %v654_v37  ;;  %v639_v42 = vld [vmem:[%s2716_s3 + $0x148] sm:$0xff]  ;;  %v657_v44 = vld [vmem:[%s2716_s3 + $0x1d8] sm:$0xff]  ;;  %v640_v47 = vld [vmem:[%s2716_s3 + $0x150] sm:$0xff] }
  0x59   :  { %1519 = vmatpush3.bf16.msra.mxu1 %v1518_v5  ;;  %v1546_v45 = vpack.c.bf16 %v639_v42, %v638_v41  ;;  %v1548_v46 = vpack.c.bf16 %v657_v44, %v656_v43  ;;  %v641_v48 = vld [vmem:[%s2716_s3 + $0x158] sm:$0xff]  ;;  %v658_v49 = vld [vmem:[%s2716_s3 + $0x1e0] sm:$0xff]  ;;  %v659_v50 = vld [vmem:[%s2716_s3 + $0x1e8] sm:$0xff] }
  0x5a   :  { %1521 = vmatprep.subr.bf16.mxu1 %v1520_v6  ;;  %v1550_v51 = vpack.c.bf16 %v641_v48, %v640_v47  ;;  %v1552_v52 = vpack.c.bf16 %v659_v50, %v658_v49  ;;  %v642_v53 = vld [vmem:[%s2716_s3 + $0x160] sm:$0xff]  ;;  %v643_v54 = vld [vmem:[%s2716_s3 + $0x168] sm:$0xff]  ;;  %v628_v56 = vld [vmem:[%s2716_s3 + $0xf0] sm:$0xff] }
  0x5b   :  { %1495 = vmatpush1.bf16.msra.mxu0 %v1494_v10  ;;  %v1554_v55 = vpack.c.bf16 %v643_v54, %v642_v53  ;;  %v629_v57 = vld [vmem:[%s2716_s3 + $0xf8] sm:$0xff]  ;;  %v612_v59 = vld [vmem:[%s2716_s3 + $0x70] sm:$0xff]  ;;  %v678_v4 = vld [vmem:[%s2716_s3 + $0x280] sm:$0xff] }
  0x5c   :  { %545 = vmatprep.subr.mxu0 %v174_v11  ;;  %v1524_v58 = vpack.c.bf16 %v629_v57, %v628_v56  ;;  %v613_v60 = vld [vmem:[%s2716_s3 + $0x78] sm:$0xff]  ;;  %v660_v61 = vld [vmem:[%s2716_s3 + $0x1f0] sm:$0xff]  ;;  %v679_v5 = vld [vmem:[%s2716_s3 + $0x288] sm:$0xff]  ;;  %v179_v11 = vlaneseq }
  0x5d   :  { %1523 = vmatpush3.bf16.msra.mxu1 %v1522_v14  ;;  %v1526_v62 = vpack.c.bf16 %v613_v60, %v612_v59  ;;  %v661_v63 = vld [vmem:[%s2716_s3 + $0x1f8] sm:$0xff]  ;;  %v644_v0 = vld [vmem:[%s2716_s3 + $0x170] sm:$0xff]  ;;  %v1560_v6 = vpack.c.bf16 %v679_v5, %v678_v4  ;;  %v710_v8 = vld [vmem:[%s2716_s3 + $0x380] sm:$0xff] }
  0x5e   :  { %v645_v1 = vld [vmem:[%s2716_s3 + $0x178] sm:$0xff]  ;;  %1525 = vmatprep.subr.bf16.mxu1 %v1524_v58  ;;  %v1556_v2 = vpack.c.bf16 %v661_v63, %v660_v61  ;;  %v711_v9 = vld [vmem:[%s2716_s3 + $0x388] sm:$0xff]  ;;  %v2402_v12 = vshrl.u32 %v179_v11, 7  ;;  %v2408_v14 = vld [vmem:[%s2715_s2] sm:$0xff] }
  0x5f   :  { %546 = vmatpush1.msra.mxu0 %v173_v19  ;;  %v1558_v3 = vpack.c.bf16 %v645_v1, %v644_v0  ;;  %v1592_v10 = vpack.c.bf16 %v711_v9, %v710_v8  ;;  %v662_v26 = vld [vmem:[%s2716_s3 + $0x200] sm:$0xff]  ;;  %v712_v35 = vld [vmem:[%s2716_s3 + $0x390] sm:$0xff]  ;;  %v713_v37 = vld [vmem:[%s2716_s3 + $0x398] sm:$0xff] }
  0x60   :  { %1205 = vmatmul.mubr.msk.f32.vlgmr.msra.gmra.mrb[4].mxu0 %vm229_vm0, %v1943_v36  ;;  %1529 = vmatprep.subr.bf16.mxu0 %v1528_v20  ;;  %v653_v36 = vld [vmem:[%s2716_s3 + $0x1b8] sm:$0xff]  ;;  %v181_v13 = vsub.s32 0, %v2402_v12  ;;  %v189_v15 = vsub.s32 2, %v2402_v12  ;;  %v185_v16 = vsub.s32 1, %v2402_v12  ;;  %v193_v17 = vsub.s32 3, %v2402_v12  ;;  %v696_v47 = vld [vmem:[%s2716_s3 + $0x310] sm:$0xff] }
  0x61   :  { %1531 = vmatpush3.bf16.msra.mxu0 %v1530_v21  ;;  %v1540_v33 = vpack.c.bf16 %v653_v36, %v652_v31  ;;  %1527 = vmatpush3.bf16.msra.mxu1 %v1526_v62  ;;  %v695_v36 = vld [vmem:[%s2716_s3 + $0x308] sm:$0xff]  ;;  %v1596_v48 = vpack.c.bf16 %v713_v37, %v712_v35  ;;  %v697_v49 = vld [vmem:[%s2716_s3 + $0x318] sm:$0xff]  ;;  %v682_v50 = vld [vmem:[%s2716_s3 + $0x2a0] sm:$0xff] }
  0x62   :  { %1533 = vmatprep.subr.bf16.mxu0 %v1532_v22  ;;  %1561 = vmatprep.subr.bf16.mxu1 %v1560_v6  ;;  %v182_v18 = vrot.slane %v2408_v14, %v181_v13  ;;  %v190_v19 = vrot.slane %v2408_v14, %v189_v15  ;;  %v186_v20 = vrot.slane %v2408_v14, %v185_v16  ;;  %v715_v53 = vld [vmem:[%s2716_s3 + $0x3a8] sm:$0xff]  ;;  %v666_v57 = vld [vmem:[%s2716_s3 + $0x220] sm:$0xff]  ;;  %v684_v62 = vld [vmem:[%s2716_s3 + $0x2b0] sm:$0xff] }
  0x63   :  { %v194_v21 = vrot.slane %v2408_v14, %v193_v17  ;;  %v667_v58 = vld [vmem:[%s2716_s3 + $0x228] sm:$0xff]  ;;  %v698_v59 = vld [vmem:[%s2716_s3 + $0x320] sm:$0xff]  ;;  %v685_v63 = vld [vmem:[%s2716_s3 + $0x2b8] sm:$0xff] }
  0x64   :  { %v699_v61 = vld [vmem:[%s2716_s3 + $0x328] sm:$0xff]  ;;  %v716_v0 = vld [vmem:[%s2716_s3 + $0x3b0] sm:$0xff]  ;;  %v717_v1 = vld [vmem:[%s2716_s3 + $0x3b8] sm:$0xff]  ;;  %v1572_v4 = vpack.c.bf16 %v685_v63, %v684_v62 }
  0x65   :  { %1535 = vmatpush3.bf16.msra.mxu0 %v1534_v27  ;;  %v663_v27 = vld [vmem:[%s2716_s3 + $0x208] sm:$0xff]  ;;  %v668_v5 = vld [vmem:[%s2716_s3 + $0x230] sm:$0xff]  ;;  %v669_v6 = vld [vmem:[%s2716_s3 + $0x238] sm:$0xff]  ;;  %v1604_v9 = vpack.c.bf16 %v717_v1, %v716_v0 }
  0x66   :  { %1537 = vmatprep.subr.bf16.mxu0 %v1536_v28  ;;  %v694_v28 = vld [vmem:[%s2716_s3 + $0x300] sm:$0xff]  ;;  %v700_v8 = vld [vmem:[%s2716_s3 + $0x330] sm:$0xff]  ;;  %v687_v15 = vld [vmem:[%s2716_s3 + $0x2c8] sm:$0xff] }
  0x67   :  { %v1594_v43 = vpack.c.bf16 %v695_v36, %v694_v28  ;;  %v686_v11 = vld [vmem:[%s2716_s3 + $0x2c0] sm:$0xff]  ;;  %v689_v28 = vld [vmem:[%s2716_s3 + $0x2d8] sm:$0xff]  ;;  %v704_v35 = vld [vmem:[%s2716_s3 + $0x350] sm:$0xff] }
  0x68   :  { %v718_v17 = vld [vmem:[%s2716_s3 + $0x3c0] sm:$0xff]  ;;  %v676_v1 = vld [vmem:[%s2716_s3 + $0x270] sm:$0xff] }
  0x69   :  { %1539 = vmatpush3.bf16.msra.mxu0 %v1538_v32  ;;  %v680_v32 = vld [vmem:[%s2716_s3 + $0x290] sm:$0xff] }
  0x6a   :  { %1541 = vmatprep.subr.bf16.mxu0 %v1540_v33  ;;  %v681_v33 = vld [vmem:[%s2716_s3 + $0x298] sm:$0xff] }
  0x6b   :  { %v1564_v44 = vpack.c.bf16 %v681_v33, %v680_v32  ;;  %v672_v33 = vld [vmem:[%s2716_s3 + $0x250] sm:$0xff] }
  0x6d   :  { %1543 = vmatpush3.bf16.msra.mxu0 %v1542_v39 }
  0x6e   :  { %1545 = vmatprep.subr.bf16.mxu0 %v1544_v40  ;;  %v1562_v40 = vpack.c.bf16 %v663_v27, %v662_v26  ;;  %v703_v26 = vld [vmem:[%s2716_s3 + $0x348] sm:$0xff]  ;;  %v688_v27 = vld [vmem:[%s2716_s3 + $0x2d0] sm:$0xff] }
  0x6f   :  { %v1580_v32 = vpack.c.bf16 %v689_v28, %v688_v27  ;;  %v728_v28 = vld [vmem:[%s2716_s3 + $0x410] sm:$0xff] }
  0x71   :  { %1547 = vmatpush3.bf16.msra.mxu0 %v1546_v45  ;;  %v664_v45 = vld [vmem:[%s2716_s3 + $0x210] sm:$0xff] }
  0x72   :  { %1549 = vmatprep.subr.bf16.mxu0 %v1548_v46  ;;  %v665_v46 = vld [vmem:[%s2716_s3 + $0x218] sm:$0xff] }
  0x73   :  { %v1566_v54 = vpack.c.bf16 %v665_v46, %v664_v45  ;;  %v201_v45 = vsub.s32 5, %v2402_v12 }
  0x75   :  { %1551 = vmatpush3.bf16.msra.mxu0 %v1550_v51  ;;  %v683_v51 = vld [vmem:[%s2716_s3 + $0x2a8] sm:$0xff] }
  0x76   :  { %1553 = vmatprep.subr.bf16.mxu0 %v1552_v52  ;;  %v714_v52 = vld [vmem:[%s2716_s3 + $0x3a0] sm:$0xff]  ;;  %v1568_v56 = vpack.c.bf16 %v683_v51, %v682_v50  ;;  %v205_v50 = vsub.s32 6, %v2402_v12 }
  0x77   :  { %v1600_v60 = vpack.c.bf16 %v715_v53, %v714_v52  ;;  %v706_v51 = vld [vmem:[%s2716_s3 + $0x360] sm:$0xff]  ;;  %v707_v53 = vld [vmem:[%s2716_s3 + $0x368] sm:$0xff] }
  0x78   :  { %v206_v62 = vrot.slane %v2408_v14, %v205_v50  ;;  %v1618_v63 = vpack.c.bf16 %v707_v53, %v706_v51  ;;  %v741_v50 = vld [vmem:[%s2716_s3 + $0x478] sm:$0xff] }
  0x79   :  { %1555 = vmatpush3.bf16.msra.mxu0 %v1554_v55  ;;  %v1598_v55 = vpack.c.bf16 %v697_v49, %v696_v47  ;;  %v675_v49 = vld [vmem:[%s2716_s3 + $0x268] sm:$0xff] }
  0x7a   :  { %1557 = vmatprep.subr.bf16.mxu0 %v1556_v2  ;;  %v1570_v2 = vpack.c.bf16 %v667_v58, %v666_v57  ;;  %v724_v57 = vld [vmem:[%s2716_s3 + $0x3f0] sm:$0xff]  ;;  %v725_v58 = vld [vmem:[%s2716_s3 + $0x3f8] sm:$0xff] }
  0x7d   :  { %1559 = vmatpush3.bf16.msra.mxu0 %v1558_v3  ;;  %v1602_v3 = vpack.c.bf16 %v699_v61, %v698_v59  ;;  %v202_v61 = vrot.slane %v2408_v14, %v201_v45  ;;  %v739_v45 = vld [vmem:[%s2716_s3 + $0x468] sm:$0xff] }
  0x7e   :  { %1593 = vmatprep.subr.bf16.mxu0 %v1592_v10  ;;  %v701_v10 = vld [vmem:[%s2716_s3 + $0x338] sm:$0xff] }
  0xf5   :  { %v299_v22 = vpop.f32.mrb[0].mxu0 }
  0xf6   :  { %v300_v23 = vadd.f32 %v299_v22, %v182_v18  ;;  %v370_v24 = vpop.f32.mrb[0].mxu1  ;;  %v301_v25 = vpop.f32.mrb[1].mxu0  ;;  %v719_v18 = vld [vmem:[%s2716_s3 + $0x3c8] sm:$0xff]  ;;  %v670_v22 = vld [vmem:[%s2716_s3 + $0x240] sm:$0xff] }
  0xf7   :  { %v371_v29 = vadd.f32 %v370_v24, %v190_v19  ;;  %v302_v30 = vadd.f32 %v301_v25, %v186_v20  ;;  %v372_v31 = vpop.f32.mrb[1].mxu1  ;;  %v1574_v19 = vpack.c.bf16 %v669_v6, %v668_v5  ;;  %v1606_v20 = vpack.c.bf16 %v701_v10, %v700_v8  ;;  %v702_v24 = vld [vmem:[%s2716_s3 + $0x340] sm:$0xff]  ;;  %v708_v5 = vld [vmem:[%s2716_s3 + $0x370] sm:$0xff]  ;;  %v709_v6 = vld [vmem:[%s2716_s3 + $0x378] sm:$0xff] }
  0xf8   :  { %v373_v34 = vadd.f32 %v372_v31, %v194_v21  ;;  %v588_v41 = vmul.f32 %v300_v23, %v300_v23  ;;  %v1576_v21 = vpack.c.bf16 %v687_v15, %v686_v11  ;;  %v671_v23 = vld [vmem:[%s2716_s3 + $0x248] sm:$0xff]  ;;  %v1608_v25 = vpack.c.bf16 %v719_v18, %v718_v17 }
  0xf9   :  { %v590_v38 = vmul.f32 %v371_v29, %v371_v29  ;;  %v589_v39 = vmul.f32 %v302_v30, %v302_v30  ;;  %v720_v29 = vld [vmem:[%s2716_s3 + $0x3d0] sm:$0xff]  ;;  %v721_v30 = vld [vmem:[%s2716_s3 + $0x3d8] sm:$0xff]  ;;  %v1578_v31 = vpack.c.bf16 %v671_v23, %v670_v22  ;;  %v1610_v36 = vpack.c.bf16 %v703_v26, %v702_v24 }
  0xfa   :  { %v591_v42 = vmul.f32 %v373_v34, %v373_v34  ;;  %v673_v34 = vld [vmem:[%s2716_s3 + $0x258] sm:$0xff]  ;;  %v1612_v37 = vpack.c.bf16 %v721_v30, %v720_v29  ;;  %v1689_v30 = vmov 0.0|0.0  }
  0xfb   :  { %816 = vmatprep.mubr.f32.mxu1 %v589_v39  ;;  %v690_v39 = vld [vmem:[%s2716_s3 + $0x2e0] sm:$0xff]  ;;  %v729_v29 = vld [vmem:[%s2716_s3 + $0x418] sm:$0xff] }
  0xfc   :  { %886 = vmatprep.mubr.f32.mxu0 %v591_v42  ;;  %817 = vmatmul.mubr.f32.vlgmr.msra.gmra.mrb[4].mxu1 %v588_v41  ;;  %v722_v41 = vld [vmem:[%s2716_s3 + $0x3e0] sm:$0xff]  ;;  %v723_v42 = vld [vmem:[%s2716_s3 + $0x3e8] sm:$0xff] }
  0xfd   :  { %887 = vmatmul.mubr.f32.vlgmr.msra.gmra.mrb[6].mxu0 %v590_v38  ;;  %1563 = vmatpush3.bf16.msra.mxu1 %v1562_v40  ;;  %v705_v38 = vld [vmem:[%s2716_s3 + $0x358] sm:$0xff]  ;;  %v691_v40 = vld [vmem:[%s2716_s3 + $0x2e8] sm:$0xff]  ;;  %v1616_v52 = vpack.c.bf16 %v723_v42, %v722_v41  ;;  %v736_v41 = vld [vmem:[%s2716_s3 + $0x450] sm:$0xff] }
  0xfe   :  { %1595 = vmatpush3.bf16.msra.mxu0 %v1594_v43  ;;  %1565 = vmatprep.subr.bf16.mxu1 %v1564_v44  ;;  %v1582_v43 = vpack.c.bf16 %v673_v34, %v672_v33  ;;  %v197_v44 = vsub.s32 4, %v2402_v12  ;;  %v1614_v46 = vpack.c.bf16 %v705_v38, %v704_v35  ;;  %v1584_v47 = vpack.c.bf16 %v691_v40, %v690_v39  ;;  %v732_v34 = vld [vmem:[%s2716_s3 + $0x430] sm:$0xff]  ;;  %v733_v35 = vld [vmem:[%s2716_s3 + $0x438] sm:$0xff]  ;;  %v734_v38 = vld [vmem:[%s2716_s3 + $0x440] sm:$0xff] }
  0xff   :  { %1597 = vmatprep.subr.bf16.mxu0 %v1596_v48  ;;  %v674_v48 = vld [vmem:[%s2716_s3 + $0x260] sm:$0xff]  ;;  %v735_v39 = vld [vmem:[%s2716_s3 + $0x448] sm:$0xff]  ;;  %v737_v42 = vld [vmem:[%s2716_s3 + $0x458] sm:$0xff] }
 0x100   :  { %v198_v59 = vrot.slane %v2408_v14, %v197_v44  ;;  %v1637_v40 = vpack.c.bf16 %v735_v39, %v734_v38  ;;  %v738_v44 = vld [vmem:[%s2716_s3 + $0x460] sm:$0xff] }
 0x101   :  { %1567 = vmatpush3.bf16.msra.mxu1 %v1566_v54  ;;  %v209_v54 = vsub.s32 7, %v2402_v12 }
 0x102   :  { %1599 = vmatpush3.bf16.msra.mxu0 %v1598_v55  ;;  %1569 = vmatprep.subr.bf16.mxu1 %v1568_v56  ;;  %v692_v55 = vld [vmem:[%s2716_s3 + $0x2f0] sm:$0xff]  ;;  %v693_v56 = vld [vmem:[%s2716_s3 + $0x2f8] sm:$0xff] }
 0x103   :  { %1601 = vmatprep.subr.bf16.mxu0 %v1600_v60  ;;  %v1586_v60 = vpack.c.bf16 %v675_v49, %v674_v48  ;;  %v1588_v0 = vpack.c.bf16 %v693_v56, %v692_v55  ;;  %v740_v49 = vld [vmem:[%s2716_s3 + $0x470] sm:$0xff]  ;;  %v743_v55 = vld [vmem:[%s2716_s3 + $0x488] sm:$0xff] }
 0x104   :  { %v1646_v53 = vpack.c.bf16 %v741_v50, %v740_v49 }
 0x105   :  { %1571 = vmatpush3.bf16.msra.mxu1 %v1570_v2  ;;  %v677_v2 = vld [vmem:[%s2716_s3 + $0x278] sm:$0xff] }
 0x106   :  { %1603 = vmatpush3.bf16.msra.mxu0 %v1602_v3  ;;  %1573 = vmatprep.subr.bf16.mxu1 %v1572_v4  ;;  %v210_v3 = vrot.slane %v2408_v14, %v209_v54  ;;  %v1620_v4 = vpack.c.bf16 %v725_v58, %v724_v57  ;;  %v1590_v15 = vpack.c.bf16 %v677_v2, %v676_v1  ;;  %v744_v58 = vld [vmem:[%s2716_s3 + $0x490] sm:$0xff] }
 0x107   :  { %1605 = vmatprep.subr.bf16.mxu0 %v1604_v9  ;;  %v1622_v14 = vpack.c.bf16 %v709_v6, %v708_v5 }
 0x109   :  { %1575 = vmatpush3.bf16.msra.mxu1 %v1574_v19 }
 0x10a   :  { %1607 = vmatpush3.bf16.msra.mxu0 %v1606_v20  ;;  %1577 = vmatprep.subr.bf16.mxu1 %v1576_v21  ;;  %v726_v20 = vld [vmem:[%s2716_s3 + $0x400] sm:$0xff]  ;;  %v727_v21 = vld [vmem:[%s2716_s3 + $0x408] sm:$0xff] }
 0x10b   :  { %1609 = vmatprep.subr.bf16.mxu0 %v1608_v25  ;;  %v1625_v27 = vpack.c.bf16 %v727_v21, %v726_v20 }
 0x10d   :  { %1579 = vmatpush3.bf16.msra.mxu1 %v1578_v31  ;;  %v1628_v31 = vpack.c.bf16 %v729_v29, %v728_v28  ;;  %v1107_v28 = vld [vmem:[%s2718_s5] sm:$0x1] }
 0x10e   :  { %1611 = vmatpush3.bf16.msra.mxu0 %v1610_v36  ;;  %1581 = vmatprep.subr.bf16.mxu1 %v1580_v32  ;;  %v730_v36 = vld [vmem:[%s2716_s3 + $0x420] sm:$0xff]  ;;  %v731_v32 = vld [vmem:[%s2716_s3 + $0x428] sm:$0xff] }
 0x10f   :  { %1613 = vmatprep.subr.bf16.mxu0 %v1612_v37  ;;  %v1631_v33 = vpack.c.bf16 %v731_v32, %v730_v36  ;;  %v1634_v37 = vpack.c.bf16 %v733_v35, %v732_v34 }
 0x111   :  { %1583 = vmatpush3.bf16.msra.mxu1 %v1582_v43  ;;  %v1640_v43 = vpack.c.bf16 %v737_v42, %v736_v41 }
 0x112   :  { %1615 = vmatpush3.bf16.msra.mxu0 %v1614_v46  ;;  %1585 = vmatprep.subr.bf16.mxu1 %v1584_v47  ;;  %v176_v46 = vld [vmem:[%s2715_s2 + $0x8] sm:$0x3]  ;;  %v1643_v47 = vpack.c.bf16 %v739_v45, %v738_v44 }
 0x113   :  { %1617 = vmatprep.subr.bf16.mxu0 %v1616_v52  ;;  %v218_v48 = vrot.slane %v176_v46, %v185_v16  ;;  %v742_v16 = vld [vmem:[%s2716_s3 + $0x480] sm:$0xff] }
 0x114   :  { %v441_v8 = vpop.f32.mrb[2].mxu0  ;;  %v1649_v57 = vpack.c.bf16 %v743_v55, %v742_v16 }
 0x115   :  { %v442_v9 = vadd.f32 %v441_v8, %v198_v59  ;;  %1587 = vmatpush3.bf16.msra.mxu1 %v1586_v60  ;;  %v443_v10 = vpop.f32.mrb[3].mxu0  ;;  %v512_v11 = vpop.f32.mrb[2].mxu1  ;;  %v745_v59 = vld [vmem:[%s2716_s3 + $0x498] sm:$0xff] }
 0x116   :  { %v444_v17 = vadd.f32 %v443_v10, %v202_v61  ;;  %v513_v18 = vadd.f32 %v512_v11, %v206_v62  ;;  %1619 = vmatpush3.bf16.msra.mxu0 %v1618_v63  ;;  %v514_v19 = vpop.f32.mrb[3].mxu1  ;;  %1589 = vmatprep.subr.bf16.mxu1 %v1588_v0  ;;  %v1652_v60 = vpack.c.bf16 %v745_v59, %v744_v58  ;;  %v746_v62 = vld [vmem:[%s2716_s3 + $0x4a0] sm:$0xff]  ;;  %v747_v63 = vld [vmem:[%s2716_s3 + $0x4a8] sm:$0xff] }
 0x117   :  { %v515_v22 = vadd.f32 %v514_v19, %v210_v3  ;;  %1621 = vmatprep.subr.bf16.mxu0 %v1620_v4  ;;  %v592_v23 = vmul.f32 %v442_v9, %v442_v9  ;;  %v214_v61 = vrot.slane %v176_v46, %v181_v13  ;;  %v1655_v0 = vpack.c.bf16 %v747_v63, %v746_v62 }
 0x118   :  { %v593_v24 = vmul.f32 %v444_v17, %v444_v17  ;;  %v594_v25 = vmul.f32 %v513_v18, %v513_v18 }
 0x119   :  { %v595_v26 = vmul.f32 %v515_v22, %v515_v22  ;;  %1591 = vmatpush3.bf16.msra.mxu1 %v1590_v15 }
 0x11a   :  { %956 = vmatprep.mubr.f32.mxu1 %v593_v24  ;;  %1623 = vmatpush3.bf16.msra.mxu0 %v1622_v14  ;;  %v1105_v24 = vld [vmem:[%s2717_s4] sm:$0xff]  ;;  %s1668_s4 = scalar_lea.vmem %s1194_s26, 32 }
 0x11b   :  { %1624 = vmatprep.subr.bf16.mxu1 %v1689_v30  ;;  %1026 = vmatprep.mubr.f32.mxu0 %v595_v26  ;;  %p1670_p2 = scmp.lt.s32.totalorder %s1668_s4, %s1664_s27 }
 0x11c   :  { %957 = vmatmul.mubr.f32.vlgmr.msra.gmra.mrb[6].mxu1 %v592_v23  ;;  %1351 = vmatprep.subr.mxu0 %v1688_v7 }
 0x11d   :  { %1626 = vmatpush1.bf16.msra.mxu1 %v1625_v27  ;;  %1027 = vmatmul.mubr.f32.vlgmr.msra.gmra.mrb[8].mxu0 %v594_v25  ;;  %v1691_v27 = vmov 1.0   ;;  %p1671_p3 = por %p1670_p2, %p1669_p1 }
 0x11e   :  { %1627 = vmatprep.subr.bf16.mxu1 %v1689_v30  ;;  %1353 = vmatprep.mubr.msk.f32.mxu0 %vm1690_vm2, %v1688_v7 }
 0x11f   :  { %p1672_p4 = pnand %p1671_p3, %p1665_p0 }
 0x121   :  { %1629 = vmatpush1.bf16.msra.mxu1 %v1628_v31 }
 0x122   :  { %1630 = vmatprep.subr.bf16.mxu1 %v1689_v30 }
 0x125   :  { %1632 = vmatpush1.bf16.msra.mxu1 %v1631_v33 }
 0x126   :  { %1633 = vmatprep.subr.bf16.mxu1 %v1689_v30 }
 0x129   :  { %1635 = vmatpush1.bf16.msra.mxu1 %v1634_v37 }
 0x12a   :  { %1636 = vmatprep.subr.bf16.mxu1 %v1689_v30 }
 0x12d   :  { %1638 = vmatpush1.bf16.msra.mxu1 %v1637_v40 }
 0x12e   :  { %1639 = vmatprep.subr.bf16.mxu1 %v1689_v30 }
 0x131   :  { %1641 = vmatpush1.bf16.msra.mxu1 %v1640_v43 }
 0x132   :  { %1642 = vmatprep.subr.bf16.mxu1 %v1689_v30 }
 0x133   :  { %v583_v51 = vpop.f32.mrb[4].mxu0 }
 0x134   :  { %v585_v52 = vpop.f32.mrb[5].mxu0  ;;  %v584_v1 = vadd.f32 %v583_v51, %v214_v61 }
 0x135   :  { %1644 = vmatpush1.bf16.msra.mxu1 %v1643_v47  ;;  %v586_v54 = vadd.f32 %v585_v52, %v218_v48 }
 0x136   :  { %1645 = vmatprep.subr.bf16.mxu1 %v1689_v30  ;;  %v596_v2 = vmul.f32 %v584_v1, %v584_v1 }
 0x137   :  { %v597_v56 = vmul.f32 %v586_v54, %v586_v54 }
 0x139   :  { %1647 = vmatpush1.bf16.msra.mxu1 %v1646_v53  ;;  %1206 = vmatprep.mubr.msk.f32.mxu1 %vm748_vm1, %v597_v56 }
 0x13a   :  { %1648 = vmatprep.subr.bf16.mxu1 %v1689_v30 }
 0x13d   :  { %1650 = vmatpush1.bf16.msra.mxu1 %v1649_v57 }
 0x13e   :  { %1651 = vmatprep.subr.bf16.mxu1 %v1689_v30 }
 0x141   :  { %1653 = vmatpush1.bf16.msra.mxu1 %v1652_v60 }
 0x142   :  { %1654 = vmatprep.subr.bf16.mxu1 %v1689_v30 }
 0x145   :  { %1656 = vmatpush1.bf16.msra.mxu1 %v1655_v0 }
 0x148   :  { %1097 = vmatmul.mubr.f32.vlgmr.msra.gmra.mrb[8].mxu1 %v596_v2 }
 0x1cf   :  { %v1241_v12 = vpop.f32.mrb[4].mxu1 }
 0x1d0   :  { %v1276_v13 = vpop.f32.mrb[6].mxu0  ;;  %v1242_v3 = vpop.f32.mrb[5].mxu1 }
 0x1d1   :  { %v1243_v4 = vadd.f32 %v1242_v3, %v1241_v12  ;;  %v1277_v5 = vpop.f32.mrb[7].mxu0 }
 0x1d2   :  { %v1278_v6 = vadd.f32 %v1277_v5, %v1276_v13 }
 0x1d4   :  { %v889_v8 = vadd.f32 %v1278_v6, %v1243_v4 }
 0x1ef   :  { %v1311_v9 = vpop.f32.mrb[6].mxu1 }
 0x1f0   :  { %v1312_v10 = vpop.f32.mrb[7].mxu1  ;;  %v1346_v11 = vpop.f32.mrb[8].mxu0 }
 0x1f1   :  { %v1313_v15 = vadd.f32 %v1312_v10, %v1311_v9  ;;  %v1347_v17 = vpop.f32.mrb[9].mxu0 }
 0x1f2   :  { %v1348_v18 = vadd.f32 %v1347_v17, %v1346_v11 }
 0x1f3   :  { %v959_v19 = vadd.f32 %v1313_v15, %v889_v8 }
 0x1f5   :  { %v1029_v14 = vadd.f32 %v1348_v18, %v959_v19 }
 0x21b   :  { %v1098_v20 = vpop.f32.mrb[8].mxu1 }
 0x21c   :  { %v1099_v21 = vadd.f32 %v1098_v20, %v1029_v14  ;;  %v1100_v22 = vpop.f32.mrb[9].mxu1 }
 0x21e   :  { %v1102_v23 = vmax.f32 %v1099_v21, 1e-10 }
 0x220   :  { %1662 = vlog2.f32 %v1102_v23 }
 0x22a   :  { %v1663_v7 = vpop.eup %1662 }
 0x22b   :  { %v1104_v25 = vmul.f32 0.6931472, %v1663_v7 }
 0x22d   :  { %v1106_v26 = vmul.f32 %v1105_v24, %v1104_v25 }
 0x22f   :  { %1352 = vmatpush3.xpose.msk.msra.mxu0 %vm1108_vm3, %v1106_v26 }
 0x232   :  { %1354 = vmatmul.mubr.msk.f32.vlgmr.msra.gmra.mrb[10].mxu0 %vm1108_vm3, %v1691_v27 }
 0x305   :  { %v1181_v29 = vpop.f32.mrb[10].mxu0 }
 0x306   :  { %v1182_v30 = vadd.f32 %v1181_v29, %v1107_v28  ;;  %v1355_v31 = vpop.f32.mrb[11].mxu0 }
 0x308   :  { %1186 = vst.msk [vmem:[#allocation2] sm:$0x1] %vm1185_vm4, %v1182_v30 }
 0x309   :  { %1675 = shalt.err (!%p1672_p4)
}
 0x30a   :  { %s1676_s5 = scalar_lea.hbm %s2719_s6, 16 }
 0x30b   :  { %p1677_p5 = scmp.ne.s32.totalorder %s2719_s6, %s1676_s5  ;;  %p1680_p6 = scmp.lt.u32.totalorder %s1676_s5, %s2719_s6 }
 0x30d   :  { %p1682_p7 = pnand %p1680_p6, %p1677_p5 }
 0x30f   :  { %1685 = shalt.err (!%p1682_p7)
}
 0x310   :  { %1196 = dma.vmem_to_hbm [thread:$0]  %s1194_s26, 16, %s2719_s6, [#allocation3]  }
 0x311   :  { %1686 = dma.done.wait [#allocation3], 16  }
 0x312   :  { %1687 = vsyncadd [#allocation3], 4294967280 }
 0x313   :  { %1200 = vsyncpa [#allocation3], 1 }

</bundles_post_ra>
